<compile_context>
chip_gen: v7x
topology: tpu7x:2x2x1
jax: 0.10.0
libtpu: 0.0.40
codegen_flags: <defaults>
</compile_context>

<pallas_src>
import jax
import jax.numpy as jnp
from jax import lax
from jax.experimental import pallas as pl
from jax.experimental.pallas import tpu as pltpu


def _round_up(x, m):
    return ((x + m - 1) // m) * m


# ---------------------------------------------------------------------------
# Kernel 1: WF = X @ W^T + b   (row-tiled, lane-dense padded F_out)
# ---------------------------------------------------------------------------
def _linear_kernel(x_ref, w_ref, b_ref, o_ref):
    o_ref[...] = (
        jnp.dot(x_ref[...], w_ref[...], preferred_element_type=jnp.float32)
        + b_ref[...]
    )


# ---------------------------------------------------------------------------
# Kernel 2: out = WF * (A_mod @ WF)
#   grid = (i row-tiles [parallel], k reduction tiles [arbitrary])
#   nz_ref: per-(i,k)-block "has any nonzero" flag (scalar prefetch, SMEM).
#   fk_ref: per-(i,k) fetch map (only used by the index_maps, not the body).
#   acc_ref: persistent f32 VMEM accumulator for the current output row tile.
# ---------------------------------------------------------------------------
def _igc_matmul_kernel(nz_ref, fk_ref, a_ref, wfk_ref, wfi_ref, o_ref, acc_ref):
    i = pl.program_id(0)
    k = pl.program_id(1)
    nk = pl.num_programs(1)

    @pl.when(k == 0)
    def _init():
        acc_ref[...] = jnp.zeros_like(acc_ref)

    # Empty A blocks: DMA already elided via the fetch map (repeated block
    # index); here we just skip the MXU work.
    @pl.when(nz_ref[i * nk + k] > 0)
    def _compute():
        acc_ref[...] += jnp.dot(a_ref[...], wfk_ref[...],
                                preferred_element_type=jnp.float32)

    @pl.when(k == nk - 1)
    def _finalize():
        o_ref[...] = wfi_ref[...] * acc_ref[...]


# ---------------------------------------------------------------------------
# Wrapper
# ---------------------------------------------------------------------------
def interaction_graph_convolution(node_features, adj_indices, adj_values,
                                  num_nodes, weight, bias, *,
                                  tm=1024, tk=512,
                                  matmul_dtype=jnp.bfloat16):
    """node_features: (N, F_in); adj_indices: (2, nnz) int; adj_values: (nnz,);
    weight: (F_out, F_in) [PyTorch nn.Linear layout]; bias: (F_out,)."""
    n = int(num_nodes)
    f_in = node_features.shape[1]
    f_out = weight.shape[0]

    # Lane-dense output width. 128 fills v5e's MXU; for wider outputs pad to a
    # 256 multiple (v6e/v7x MXU width). Sliced back to f_out at the end.
    f_out_pad = 128 if f_out <= 128 else _round_up(f_out, 256)

    # Tiles: TK | TM, both multiples of 128, clamped for small graphs; n padded
    # to a multiple of TM (hence also of TK).
    tk = _round_up(min(int(tk), _round_up(n, 128)), 128)
    tm = min(int(tm), _round_up(n, tk))
    tm = _round_up(max(tm, tk), tk)
    n_pad = _round_up(n, tm)
    nbi = n_pad // tm
    nbk = n_pad // tk

    rows = adj_indices[0].astype(jnp.int32)
    cols = adj_indices[1].astype(jnp.int32)
    offdiag = rows != cols
    vals = jnp.where(offdiag, adj_values.astype(jnp.float32), 0.0)

    # A_mod = (coalesced A with zeroed diagonal) ** 2, built directly in the
    # padded buffer: O(nnz) scatter-add (== coalesce) + one square/cast pass.
    # TODO(synk): for truly large graphs keep the adjacency sparse end-to-end
    # (in-kernel CSR row gather) instead of densifying in the wrapper.
    a_coal = jnp.zeros((n_pad, n_pad), jnp.float32).at[rows, cols].add(vals)
    a_mod = (a_coal * a_coal).astype(matmul_dtype)

    # Per-(i,k)-block nonzero flags straight from the COO indices (O(nnz)).
    nzmap = (jnp.zeros((nbi, nbk), jnp.int32)
             .at[rows // tm, cols // tk].max(offdiag.astype(jnp.int32)))
    # Fetch map: empty blocks reuse the nearest nonzero block index in their row
    # (previous if any, else the row's first nonzero) so consecutive grid steps
    # present a repeated block index and Pallas issues no new DMA for them.
    k_ids = jnp.arange(nbk, dtype=jnp.int32)[None, :]
    last_nz = lax.cummax(jnp.where(nzmap > 0, k_ids, -1), axis=1)
    first_nz = jnp.argmax(nzmap > 0, axis=1).astype(jnp.int32)[:, None]
    fetch_k = jnp.where(last_nz >= 0, last_nz, first_nz).astype(jnp.int32)
    nz_flat = nzmap.reshape(-1)
    fk_flat = fetch_k.reshape(-1)

    # Padded linear-layer inputs.
    x = jnp.zeros((n_pad, f_in), jnp.float32).at[:n].set(
        node_features.astype(jnp.float32))
    w_t = jnp.zeros((f_in, f_out_pad), jnp.float32).at[:, :f_out].set(
        weight.T.astype(jnp.float32))
    b2d = jnp.zeros((1, f_out_pad), jnp.float32).at[0, :f_out].set(
        bias.astype(jnp.float32))

    # --- WF = X @ W^T + b, computed once (row-tiled) ---
    wf = pl.pallas_call(
        _linear_kernel,
        out_shape=jax.ShapeDtypeStruct((n_pad, f_out_pad), jnp.float32),
        grid_spec=pltpu.PrefetchScalarGridSpec(
            num_scalar_prefetch=0,
            grid=(nbi,),
            in_specs=[
                pl.BlockSpec((tm, f_in), lambda i: (i, 0)),
                pl.BlockSpec((f_in, f_out_pad), lambda i: (0, 0)),
                pl.BlockSpec((1, f_out_pad), lambda i: (0, 0)),
            ],
            out_specs=pl.BlockSpec((tm, f_out_pad), lambda i: (i, 0)),
        ),
        compiler_params=pltpu.CompilerParams(
            dimension_semantics=("parallel",)),
    )(x, w_t, b2d)

    wf_mm = wf.astype(matmul_dtype)   # bf16 copy used only as the MXU k-operand

    a_bytes = jnp.dtype(matmul_dtype).itemsize
    cost = pl.CostEstimate(
        flops=int(2 * n_pad * n_pad * f_out_pad + n_pad * f_out_pad),
        transcendentals=0,
        bytes_accessed=int(a_bytes * n_pad * n_pad                  # A stream
                           + a_bytes * n_pad * f_out_pad * nbi      # WF-k re-reads
                           + 4 * n_pad * f_out_pad                  # WF-i
                           + 4 * n_pad * f_out_pad),                # out
    )

    out_pad = pl.pallas_call(
        _igc_matmul_kernel,
        out_shape=jax.ShapeDtypeStruct((n_pad, f_out_pad), jnp.float32),
        grid_spec=pltpu.PrefetchScalarGridSpec(
            num_scalar_prefetch=2,
            grid=(nbi, nbk),
            in_specs=[
                # A tile: empty blocks remapped to the last-fetched nonzero block.
                pl.BlockSpec((tm, tk),
                             lambda i, k, nz, fk: (i, fk[i * nbk + k])),
                # WF rows for the reduction block k (bf16), same remapping.
                pl.BlockSpec((tk, f_out_pad),
                             lambda i, k, nz, fk: (fk[i * nbk + k], 0)),
                # WF rows for the output block i (f32, resident across k).
                pl.BlockSpec((tm, f_out_pad),
                             lambda i, k, nz, fk: (i, 0)),
            ],
            out_specs=pl.BlockSpec((tm, f_out_pad),
                                   lambda i, k, nz, fk: (i, 0)),
            scratch_shapes=[pltpu.VMEM((tm, f_out_pad), jnp.float32)],
        ),
        compiler_params=pltpu.CompilerParams(
            dimension_semantics=("parallel", "arbitrary"),
            vmem_limit_bytes=48 * 1024 * 1024,   # fits v7x's 64 MiB with headroom
        ),
        cost_estimate=cost,
    )(nz_flat, fk_flat, a_mod, wf_mm, wf)

    return out_pad[:n, :f_out]


# ---------------------------------------------------------------------------
# Reference (plain JAX) for checking. matmul_dtype lets us match the kernel's
# bf16 MXU operands so tolerances stay tight and meaningful.
# ---------------------------------------------------------------------------
def _reference(node_features, rows, cols, vals, n, weight, bias,
               matmul_dtype=jnp.float32):
    v = jnp.where(rows != cols, vals.astype(jnp.float32), 0.0)
    a = jnp.zeros((n, n), jnp.float32).at[rows, cols].add(v)
    a_mod = a * a
    wf = (jnp.dot(node_features.astype(jnp.float32),
                  weight.T.astype(jnp.float32))
          + bias.astype(jnp.float32))
    temp = jnp.dot(a_mod.astype(matmul_dtype), wf.astype(matmul_dtype),
                   preferred_element_type=jnp.float32)
    return wf * temp


if __name__ == "__main__":
    F_IN, F_OUT = 8, 32
    bound = 1.0 / (F_IN ** 0.5)
    base_key = jax.random.PRNGKey(0)

    def make_case(case_id, n, nnz, col_lo, col_hi, val_lo, val_hi):
        ks = jax.random.split(jax.random.fold_in(base_key, case_id), 6)
        w = jax.random.uniform(ks[0], (F_OUT, F_IN), jnp.float32, -bound, bound)
        b = jax.random.uniform(ks[1], (F_OUT,), jnp.float32, -bound, bound)
        x = jax.random.normal(ks[2], (n, F_IN), jnp.float32)
        r = jax.random.randint(ks[3], (nnz,), 0, n)
        c = jax.random.randint(ks[4], (nnz,), col_lo, col_hi)
        v = jax.random.uniform(ks[5], (nnz,), jnp.float32, val_lo, val_hi)
        return w, b, x, r, c, v

    def run_case(case_id, n, nnz, col_lo, col_hi, val_lo, val_hi, **tiles):
        w, b, x, r, c, v = make_case(case_id, n, nnz, col_lo, col_hi,
                                     val_lo, val_hi)
        idx = jnp.stack([r, c], axis=0)
        out = interaction_graph_convolution(x, idx, v, n, w, b, **tiles)
        jax.block_until_ready(out)
        ref = _reference(x, r, c, v, n, w, b, matmul_dtype=jnp.bfloat16)
        assert out.shape == (n, F_OUT), f"case {case_id}: bad shape {out.shape}"
        # bf16 MXU operands + default-precision f32 linear -> modest tolerance.
        assert bool(jnp.allclose(out, ref, atol=2e-2, rtol=2e-2)), \
            f"case {case_id}: mismatch vs reference"

    # Case 1: tiny graph, single-tile grid (TM/TK clamp path).
    run_case(1, n=16, nnz=48, col_lo=0, col_hi=16, val_lo=0.1, val_hi=1.0)

    # Case 2: 2x2 block grid — exercises the accumulator, row padding, and the
    # zero-block skip (all cols < 100 -> trailing k-block column is empty).
    run_case(2, n=200, nnz=600, col_lo=0, col_hi=100, val_lo=-1.0, val_hi=1.0,
             tm=128, tk=128)

    # Case 3: decoupled TM != TK, leading AND trailing empty k-blocks
    # (cols in [130, 250) -> only block column 1 of 4 is nonzero).
    run_case(3, n=300, nnz=800, col_lo=130, col_hi=250, val_lo=-1.0, val_hi=1.0,
             tm=256, tk=128)

    print("KERNEL_OK")
</pallas_src>

<mosaic_0001>
module attributes {stable_mosaic.version = 11 : i64} {
  func.func @_linear_kernel(%arg0: i32, %arg1: memref<128x8xf32, #tpu.memory_space<vmem>>, %arg2: memref<8x128xf32, #tpu.memory_space<vmem>>, %arg3: memref<1x128xf32, #tpu.memory_space<vmem>>, %arg4: memref<128x128xf32, #tpu.memory_space<vmem>>) attributes {dimension_semantics = [#tpu.dimension_semantics<parallel>], iteration_bounds = array<i64: 1>, scalar_prefetch = 0 : i64, scratch_operands = 0 : i64, tpu.core_type = #tpu.core_type<tc>, window_params = [{transform_indices = @transform_0, window_bounds = array<i64: 128, 8>}, {pipeline_mode = #tpu.pipeline_mode<synchronous>, transform_indices = @transform_1, window_bounds = array<i64: 8, 128>}, {pipeline_mode = #tpu.pipeline_mode<synchronous>, transform_indices = @transform_2, window_bounds = array<i64: 1, 128>}, {transform_indices = @transform_3, window_bounds = array<i64: 128, 128>}]} {
    %c0 = arith.constant 0 : index
    %c0_0 = arith.constant 0 : index
    %0 = vector.load %arg1[%c0, %c0_0] : memref<128x8xf32, #tpu.memory_space<vmem>>, vector<128x8xf32>
    %c0_1 = arith.constant 0 : index
    %c0_2 = arith.constant 0 : index
    %1 = vector.load %arg2[%c0_1, %c0_2] : memref<8x128xf32, #tpu.memory_space<vmem>>, vector<8x128xf32>
    %cst = arith.constant dense<0.000000e+00> : vector<128x128xf32>
    %2 = tpu.matmul %0, %1, %cst {dimension_numbers = #tpu.dot_dimension_numbers<[1], [0], [0], [1], [0, 0, 1, 1], [], []>} : vector<128x8xf32>, vector<8x128xf32>, vector<128x128xf32> -> vector<128x128xf32>
    %c0_3 = arith.constant 0 : index
    %c0_4 = arith.constant 0 : index
    %3 = vector.load %arg3[%c0_3, %c0_4] : memref<1x128xf32, #tpu.memory_space<vmem>>, vector<1x128xf32>
    %4 = vector.broadcast %3 : vector<1x128xf32> to vector<128x128xf32>
    %5 = arith.addf %2, %4 : vector<128x128xf32>
    %c0_5 = arith.constant 0 : index
    %c0_6 = arith.constant 0 : index
    %6 = vector.load %arg4[%c0_5, %c0_6] : memref<128x128xf32, #tpu.memory_space<vmem>>, vector<128x128xf32>
    tpu.vector_store %arg4[%c0_5, %c0_6], %5 {strides = array<i32>} : memref<128x128xf32, #tpu.memory_space<vmem>>, vector<128x128xf32>,
    return
  }
  func.func @transform_0(%arg0: i32) -> (i32, i32) {
    %c0_i32 = arith.constant 0 : i32
    %c0_i32_0 = arith.constant 0 : i32
    return %arg0, %c0_i32 : i32, i32
  }
  func.func @transform_1(%arg0: i32) -> (i32, i32) {
    %c0_i32 = arith.constant 0 : i32
    %c0_i32_0 = arith.constant 0 : i32
    %c0_i32_1 = arith.constant 0 : i32
    return %c0_i32, %c0_i32_0 : i32, i32
  }
  func.func @transform_2(%arg0: i32) -> (i32, i32) {
    %c0_i32 = arith.constant 0 : i32
    %c0_i32_0 = arith.constant 0 : i32
    %c0_i32_1 = arith.constant 0 : i32
    return %c0_i32, %c0_i32_0 : i32, i32
  }
  func.func @transform_3(%arg0: i32) -> (i32, i32) {
    %c0_i32 = arith.constant 0 : i32
    %c0_i32_0 = arith.constant 0 : i32
    return %arg0, %c0_i32 : i32, i32
  }
}

</mosaic_0001>

<bundles_post_ra>
// kernel: tpu_custom_call.1
= control target key start
LH: loop header
LB: loop body
LE: loop exit
PB: predicated region body
PF: predicated region fallthrough
CT: control target
= control target key end

     0   :  { %vm39_vm0 = vcmask 64512   ;;  %s459_s0 = inlined_call_operand.vmem [shape: f32[128,8], index: 0, kind: input, shape index: {}]   ;;  %s460_s1 = inlined_call_operand.vmem [shape: f32[8,128], index: 1, kind: input, shape index: {}]   ;;  %s461_s2 = inlined_call_operand.vmem [shape: f32[1,128], index: 2, kind: input, shape index: {}]   ;;  %s462_s3 = inlined_call_operand.hbm [shape: f32[128,128], index: 3, kind: output, shape index: {}]  }
   0x1   :  { %v31_v0 = vld [vmem:[%s460_s1] sm:$0xff]  ;;  %v16_v3 = vld [vmem:[%s459_s0 + $0x8] sm:$0xff]  ;;  %v17_v5 = vld [vmem:[%s459_s0 + $0x10] sm:$0xff] }
   0x2   :  { %v15_v1 = vld [vmem:[%s459_s0] sm:$0xff]  ;;  %299 = vmatprep.subr.mxu0 %v31_v0  ;;  %325 = vmatprep.subr.mxu1 %v31_v0  ;;  %v24_v4 = vld [vmem:[%s459_s0 + $0x48] sm:$0xff]  ;;  %v25_v6 = vld [vmem:[%s459_s0 + $0x50] sm:$0xff] }
   0x3   :  { %v23_v2 = vld [vmem:[%s459_s0 + $0x40] sm:$0xff]  ;;  %300 = vmatpush3.msra.mxu0 %v31_v0  ;;  %326 = vmatpush3.msra.mxu1 %v31_v0  ;;  %v18_v7 = vld [vmem:[%s459_s0 + $0x18] sm:$0xff] }
   0x4   :  { %301 = vmatprep.mubr.msk.f32.mxu0 %vm39_vm0, %v15_v1  ;;  %313 = vmatprep.mubr.msk.f32.mxu1 %vm39_vm0, %v23_v2  ;;  %v26_v8 = vld [vmem:[%s459_s0 + $0x58] sm:$0xff] }
   0x5   :  { %302 = vmatmul.mubr.msk.f32.vlgmr.msra.gmra.mrb[0].mxu0 %vm39_vm0, %v16_v3  ;;  %314 = vmatmul.mubr.msk.f32.vlgmr.msra.gmra.mrb[0].mxu1 %vm39_vm0, %v24_v4 }
   0x6   :  { %304 = vmatprep.mubr.msk.f32.mxu0 %vm39_vm0, %v17_v5  ;;  %316 = vmatprep.mubr.msk.f32.mxu1 %vm39_vm0, %v25_v6 }
   0x7   :  { %8 = vsyncpa [#allocation3], 0  ;;  %v19_v9 = vld [vmem:[%s459_s0 + $0x20] sm:$0xff]  ;;  %v20_v11 = vld [vmem:[%s459_s0 + $0x28] sm:$0xff] }
   0x8   :  { %v27_v10 = vld [vmem:[%s459_s0 + $0x60] sm:$0xff]  ;;  %v28_v12 = vld [vmem:[%s459_s0 + $0x68] sm:$0xff]  ;;  %v21_v13 = vld [vmem:[%s459_s0 + $0x30] sm:$0xff] }
   0x9   :  { %305 = vmatmul.mubr.msk.f32.gmra.mrb[2].mxu0 %vm39_vm0, %v18_v7  ;;  %317 = vmatmul.mubr.msk.f32.gmra.mrb[2].mxu1 %vm39_vm0, %v26_v8  ;;  %v29_v14 = vld [vmem:[%s459_s0 + $0x70] sm:$0xff]  ;;  %v22_v15 = vld [vmem:[%s459_s0 + $0x38] sm:$0xff]  ;;  %v265_v17 = vld [vmem:[%s461_s2] ss:$0 sm:$0xff] }
   0xa   :  { %307 = vmatprep.mubr.msk.f32.mxu0 %vm39_vm0, %v19_v9  ;;  %319 = vmatprep.mubr.msk.f32.mxu1 %vm39_vm0, %v27_v10  ;;  %v30_v16 = vld [vmem:[%s459_s0 + $0x78] sm:$0xff]  ;;  %s354_s0 = smov [#allocation2]  }
   0xb   :  { %s254_s2 = sshll.u32 %s354_s0, 4  ;;  %s255_s2 = int_to_ptr.vmem [resolvable:$true] %s254_s2 }
   0xc   :  { %s330_s20 = scalar_lea.vmem %s255_s2, 2048  ;;  %p335_p1 = scmp.lt.s32.totalorder %s255_s2, %s255_s2 }
   0xd   :  { %308 = vmatmul.mubr.msk.f32.gmra.mrb[4].mxu0 %vm39_vm0, %v20_v11  ;;  %320 = vmatmul.mubr.msk.f32.gmra.mrb[4].mxu1 %vm39_vm0, %v28_v12  ;;  %p331_p0 = scmp.ne.s32.totalorder %s255_s2, %s330_s20  ;;  %p336_p2 = scmp.lt.s32.totalorder %s330_s20, %s330_s20 }
   0xe   :  { %310 = vmatprep.mubr.msk.f32.mxu0 %vm39_vm0, %v21_v13  ;;  %322 = vmatprep.mubr.msk.f32.mxu1 %vm39_vm0, %v29_v14 }
   0xf   :  { %p337_p3 = por %p336_p2, %p335_p1 }
  0x11   :  { %311 = vmatmul.mubr.msk.f32.gmra.mrb[6].mxu0 %vm39_vm0, %v22_v15  ;;  %323 = vmatmul.mubr.msk.f32.gmra.mrb[6].mxu1 %vm39_vm0, %v30_v16  ;;  %p338_p4 = pnand %p337_p3, %p331_p0 }
  0xd8   :  { %v303_v18 = vpop.f32.mrb[0].mxu0  ;;  %v315_v19 = vpop.f32.mrb[0].mxu1 }
  0xd9   :  { %v160_v20 = vadd.f32 %v303_v18, %v265_v17  ;;  %v200_v21 = vadd.f32 %v315_v19, %v265_v17  ;;  %v154_v22 = vpop.f32.mrb[1].mxu0  ;;  %v194_v23 = vpop.f32.mrb[1].mxu1 }
  0xda   :  { %v155_v24 = vadd.f32 %v265_v17, %v154_v22  ;;  %v195_v25 = vadd.f32 %v265_v17, %v194_v23 }
  0xdb   :  { %234 = vst [vmem:[#allocation2 + $0x8] sm:$0xff] %v160_v20  ;;  %242 = vst [vmem:[#allocation2 + $0x48] sm:$0xff] %v200_v21 }
  0xdc   :  { %233 = vst [vmem:[#allocation2] sm:$0xff] %v155_v24  ;;  %241 = vst [vmem:[#allocation2 + $0x40] sm:$0xff] %v195_v25  ;;  %v306_v26 = vpop.f32.mrb[2].mxu0  ;;  %v318_v27 = vpop.f32.mrb[2].mxu1 }
  0xdd   :  { %v170_v28 = vadd.f32 %v306_v26, %v265_v17  ;;  %v210_v29 = vadd.f32 %v318_v27, %v265_v17  ;;  %v164_v30 = vpop.f32.mrb[3].mxu0  ;;  %v204_v31 = vpop.f32.mrb[3].mxu1 }
  0xde   :  { %v165_v32 = vadd.f32 %v265_v17, %v164_v30  ;;  %v205_v33 = vadd.f32 %v265_v17, %v204_v31 }
  0xdf   :  { %236 = vst [vmem:[#allocation2 + $0x18] sm:$0xff] %v170_v28  ;;  %244 = vst [vmem:[#allocation2 + $0x58] sm:$0xff] %v210_v29 }
  0xe0   :  { %235 = vst [vmem:[#allocation2 + $0x10] sm:$0xff] %v165_v32  ;;  %243 = vst [vmem:[#allocation2 + $0x50] sm:$0xff] %v205_v33  ;;  %v309_v34 = vpop.f32.mrb[4].mxu0  ;;  %v321_v35 = vpop.f32.mrb[4].mxu1 }
  0xe1   :  { %v180_v36 = vadd.f32 %v309_v34, %v265_v17  ;;  %v220_v37 = vadd.f32 %v321_v35, %v265_v17  ;;  %v174_v38 = vpop.f32.mrb[5].mxu0  ;;  %v214_v39 = vpop.f32.mrb[5].mxu1 }
  0xe2   :  { %v175_v40 = vadd.f32 %v265_v17, %v174_v38  ;;  %v215_v41 = vadd.f32 %v265_v17, %v214_v39 }
  0xe3   :  { %238 = vst [vmem:[#allocation2 + $0x28] sm:$0xff] %v180_v36  ;;  %246 = vst [vmem:[#allocation2 + $0x68] sm:$0xff] %v220_v37 }
  0xe4   :  { %237 = vst [vmem:[#allocation2 + $0x20] sm:$0xff] %v175_v40  ;;  %245 = vst [vmem:[#allocation2 + $0x60] sm:$0xff] %v215_v41  ;;  %v312_v42 = vpop.f32.mrb[6].mxu0  ;;  %v324_v43 = vpop.f32.mrb[6].mxu1 }
  0xe5   :  { %v190_v44 = vadd.f32 %v312_v42, %v265_v17  ;;  %v230_v45 = vadd.f32 %v324_v43, %v265_v17  ;;  %v184_v46 = vpop.f32.mrb[7].mxu0  ;;  %v224_v47 = vpop.f32.mrb[7].mxu1 }
  0xe6   :  { %v185_v48 = vadd.f32 %v265_v17, %v184_v46  ;;  %v225_v49 = vadd.f32 %v265_v17, %v224_v47 }
  0xe7   :  { %240 = vst [vmem:[#allocation2 + $0x38] sm:$0xff] %v190_v44  ;;  %248 = vst [vmem:[#allocation2 + $0x78] sm:$0xff] %v230_v45 }
  0xe8   :  { %239 = vst [vmem:[#allocation2 + $0x30] sm:$0xff] %v185_v48  ;;  %247 = vst [vmem:[#allocation2 + $0x70] sm:$0xff] %v225_v49 }
  0xe9   :  { %341 = shalt.err (!%p338_p4)
}
  0xea   :  { %s342_s22 = scalar_lea.hbm %s462_s3, 2048 }
  0xeb   :  { %p343_p5 = scmp.ne.s32.totalorder %s462_s3, %s342_s22  ;;  %p346_p6 = scmp.lt.u32.totalorder %s342_s22, %s462_s3 }
  0xed   :  { %p348_p7 = pnand %p346_p6, %p343_p5 }
  0xef   :  { %351 = shalt.err (!%p348_p7)
}
  0xf0   :  { %s355_s27 = smov 128   ;;  %s356_s28 = smov 8  }
  0xf1   :  { %260 = dma.vmem_to_hbm [thread:$0]  %s255_s2, 2048, %s462_s3, [#allocation3], %s355_s27, %s355_s27, %s356_s28  }
  0xf2   :  { %352 = dma.done.wait [#allocation3], 2048  }
  0xf3   :  { %353 = vsyncadd [#allocation3], 4294965248 }
  0xf4   :  { %264 = vsyncpa [#allocation3], 1 }

</bundles_post_ra>
